<compile_context>
chip_gen: v7x
topology: tpu7x:2x2x1
jax: 0.10.0
libtpu: 0.0.40
codegen_flags: <defaults>
</compile_context>

<pallas_src>
import jax
import jax.numpy as jnp
from jax.experimental import pallas as pl
from jax.experimental.pallas import tpu as pltpu

_LANE = 128
_MiB = 1024 * 1024


def _physical_vmem_bytes():
    """Per-core VMEM capacity; conservative fallback (v7x: 64 MiB)."""
    try:
        return int(pltpu.get_tpu_info().vmem_capacity_bytes)
    except Exception:
        return 64 * _MiB


def _pick_tile(d, cap):
    """Largest power-of-two multiple of 128 that divides d (<= cap), else d."""
    best = None
    t = _LANE
    while t <= min(d, cap):
        if d % t == 0:
            best = t
        t *= 2
    return best if best is not None else d


def _vmem_footprint(B, D, tk, tn, x_item, w_item, o_item, use_scratch):
    """Conservative double-buffered VMEM bytes for one pallas_call."""
    xb = 2 * B * D * x_item          # resident activations
    wb = 2 * tk * tn * w_item        # streamed weight tile
    bb = 2 * 8 * tn * w_item         # bias tile (padded to 8 sublanes)
    ob = 2 * B * tn * o_item         # output tile
    ab = B * tn * 4 if use_scratch else 0
    return xb + wb + bb + ob + ab


def _make_kernel(tk, use_scratch, has_prefetch):
    """Build the kernel body. Grid = (N tiles, K tiles); K (reduction) last."""

    def body(x_ref, w_ref, b_ref, o_ref, acc_ref):
        k = pl.program_id(1)
        acc = o_ref if acc_ref is None else acc_ref

        @pl.when(k == 0)
        def _init():
            # Fold the bias into the accumulator init (no finalize add).
            acc[...] = jnp.broadcast_to(
                b_ref[...].astype(acc.dtype), acc.shape)

        start = k * tk
        if tk % _LANE == 0:
            start = pl.multiple_of(start, _LANE)
        x = x_ref[:, pl.ds(start, tk)]          # resident X, sliced in-kernel
        acc[...] += jnp.dot(
            x, w_ref[...], preferred_element_type=jnp.float32
        ).astype(acc.dtype)

        if acc_ref is not None:
            @pl.when(k == pl.num_programs(1) - 1)
            def _finish():
                o_ref[...] = acc_ref[...].astype(o_ref.dtype)

    if has_prefetch and use_scratch:
        def kernel(idx_ref, x_ref, w_ref, b_ref, o_ref, acc_ref):
            del idx_ref  # consumed by the index_maps (child selection)
            body(x_ref, w_ref, b_ref, o_ref, acc_ref)
    elif has_prefetch:
        def kernel(idx_ref, x_ref, w_ref, b_ref, o_ref):
            del idx_ref
            body(x_ref, w_ref, b_ref, o_ref, None)
    elif use_scratch:
        def kernel(x_ref, w_ref, b_ref, o_ref, acc_ref):
            body(x_ref, w_ref, b_ref, o_ref, acc_ref)
    else:
        def kernel(x_ref, w_ref, b_ref, o_ref):
            body(x_ref, w_ref, b_ref, o_ref, None)
    return kernel


def pull_up_child_value(batch, child_weights, child_biases, child_index,
                        *, tk=None, tn=None):
    """OperationNode.pull_up_child_value: evaluate child `child_index` on batch.

    batch:         (B, D)              activations
    child_weights: (n_children, D, D)  per-child weights (bf16 recommended)
    child_biases:  (n_children, 1, D)  per-child biases  (bf16 recommended)
    child_index:   python int (static) or int32 scalar (dynamic dispatch;
                   out-of-range indices are clamped to [0, n_children-1]).
    Output dtype == batch dtype; accumulation is always f32.
    """
    B, D = batch.shape
    n_children = child_weights.shape[0]
    assert child_weights.shape == (n_children, D, D)
    assert child_biases.shape == (n_children, 1, D)

    out_dtype = batch.dtype
    w_dtype = child_weights.dtype
    # Pre-cast activations once to the weight dtype (bf16 is the native MXU
    # input); all accumulation stays f32 in-kernel.
    x = batch.astype(w_dtype) if batch.dtype != w_dtype else batch

    x_item = jnp.dtype(x.dtype).itemsize
    w_item = jnp.dtype(w_dtype).itemsize
    o_item = jnp.dtype(out_dtype).itemsize
    use_scratch = out_dtype != jnp.float32   # accumulate into o_ref when f32

    phys_vmem = _physical_vmem_bytes()
    budget = min((phys_vmem * 3) // 4, 96 * _MiB)   # ~48 MiB v7x, 96 MiB v5e/v6e

    # Tile selection: as big as the VMEM budget allows (per-grid-step pipeline
    # overhead ~0.35us dominates with small tiles); keep >= 2 N tiles when D
    # is large so both v7x TensorCores are fed.
    if tk is None:
        tk = _pick_tile(D, 2048)
    if tn is None:
        tn = _pick_tile(D, 2048)
        if D // tn < 2 and D >= 1024:
            tn = _pick_tile(D, max(512, tn // 2))
    assert D % tk == 0 and D % tn == 0

    while _vmem_footprint(B, D, tk, tn, x_item, w_item, o_item,
                          use_scratch) > budget:
        if tn >= tk:
            new = _pick_tile(D, tn // 2)
            if new >= tn:
                break
            tn = new
        else:
            new = _pick_tile(D, tk // 2)
            if new >= tk:
                break
            tk = new
    # TODO(synk): if B grows past a few hundred rows, add a 'parallel' M grid
    # axis (tile B); resident x/out blocks scale linearly with B.

    grid = (D // tn, D // tk)   # reduction (K) axis last

    footprint = _vmem_footprint(B, D, tk, tn, x_item, w_item, o_item,
                                use_scratch)
    vmem_limit = int(min(max(footprint + 4 * _MiB, 16 * _MiB),
                         max(budget, footprint + 2 * _MiB)))

    cost = pl.CostEstimate(
        flops=2 * B * D * D,
        transcendentals=0,
        bytes_accessed=(D * D * w_item      # selected child's weights
                        + D * w_item        # selected child's bias
                        + B * D * x_item    # resident activations (read once)
                        + B * D * o_item),  # output write
    )
    params = pltpu.CompilerParams(
        dimension_semantics=("parallel", "arbitrary"),
        vmem_limit_bytes=vmem_limit,
    )
    out_shape = jax.ShapeDtypeStruct((B, D), out_dtype)
    scratch = [pltpu.VMEM((B, tn), jnp.float32)] if use_scratch else []

    if isinstance(child_index, int):
        # Static child index: slice params in the wrapper; no scalar prefetch.
        w = child_weights[child_index]
        bias = child_biases[child_index]
        grid_spec = pltpu.PrefetchScalarGridSpec(
            num_scalar_prefetch=0,
            grid=grid,
            in_specs=[
                pl.BlockSpec((B, D), lambda n, k: (0, 0)),      # resident X
                pl.BlockSpec((tk, tn), lambda n, k: (k, n)),    # weight stream
                pl.BlockSpec((1, tn), lambda n, k: (0, n)),     # bias
            ],
            out_specs=pl.BlockSpec((B, tn), lambda n, k: (0, n)),
            scratch_shapes=scratch,
        )
        return pl.pallas_call(
            _make_kernel(tk, use_scratch, has_prefetch=False),
            out_shape=out_shape,
            grid_spec=grid_spec,
            compiler_params=params,
            cost_estimate=cost,
        )(x, w, bias)

    # Dynamic child index: clamp, then SMEM scalar prefetch drives the
    # weight/bias index_maps so only the selected child's tiles are DMA'd.
    idx = jnp.clip(jnp.asarray(child_index, jnp.int32), 0, n_children - 1)
    idx = idx.reshape((1,))
    grid_spec = pltpu.PrefetchScalarGridSpec(
        num_scalar_prefetch=1,
        grid=grid,
        in_specs=[
            pl.BlockSpec((B, D), lambda n, k, idx_ref: (0, 0)),
            pl.BlockSpec((None, tk, tn),
                         lambda n, k, idx_ref: (idx_ref[0], k, n)),
            pl.BlockSpec((None, 1, tn),
                         lambda n, k, idx_ref: (idx_ref[0], 0, n)),
        ],
        out_specs=pl.BlockSpec((B, tn), lambda n, k, idx_ref: (0, n)),
        scratch_shapes=scratch,
    )
    return pl.pallas_call(
        _make_kernel(tk, use_scratch, has_prefetch=True),
        out_shape=out_shape,
        grid_spec=grid_spec,
        compiler_params=params,
        cost_estimate=cost,
    )(idx, x, child_weights, child_biases)


if __name__ == "__main__":
    key = jax.random.PRNGKey(0)
    B, D, N_CHILDREN = 8, 256, 3

    k_x, k_w, k_b = jax.random.split(key, 3)
    batch = jax.random.normal(k_x, (B, D), dtype=jnp.float32)
    # Weights/biases stored in bf16: the kernel is weight-bandwidth bound and
    # bf16 is the native MXU input dtype on v5e/v6e/v7x.  (Introduces ~1e-2
    # relative error vs a pure-f32 reference, matching the bf16 reference.)
    child_weights = (0.1 * jax.random.normal(
        k_w, (N_CHILDREN, D, D), dtype=jnp.float32)).astype(jnp.bfloat16)
    child_biases = (0.1 * jax.random.normal(
        k_b, (N_CHILDREN, 1, D), dtype=jnp.float32)).astype(jnp.bfloat16)

    def ref(x, i):
        y = jnp.dot(x.astype(jnp.bfloat16), child_weights[i],
                    preferred_element_type=jnp.float32)
        return (y + child_biases[i].astype(jnp.float32)).astype(x.dtype)

    # 1) Dynamic (traced) child index, default tiles: D=256 collapses to a
    #    single grid step with the whole DxD weight as one block.
    out_dyn = pull_up_child_value(batch, child_weights, child_biases,
                                  jnp.int32(1))
    out_dyn = jax.block_until_ready(out_dyn)
    assert out_dyn.shape == (B, D)
    assert jnp.allclose(out_dyn, ref(batch, 1), atol=1e-3, rtol=1e-3), \
        "dynamic path mismatch"

    # 2) Static (python int) index with forced 128 tiles: (2, 2) grid,
    #    exercises accumulate-directly-into-o_ref across the K axis.
    out_sta = pull_up_child_value(batch, child_weights, child_biases, 2,
                                  tk=128, tn=128)
    out_sta = jax.block_until_ready(out_sta)
    assert out_sta.shape == (B, D)
    assert jnp.allclose(out_sta, ref(batch, 2), atol=1e-3, rtol=1e-3), \
        "static path mismatch"

    # 3) bf16 batch (non-f32 output): exercises the f32 VMEM scratch path.
    batch_bf = batch.astype(jnp.bfloat16)
    out_bf = pull_up_child_value(batch_bf, child_weights, child_biases, 0,
                                 tk=128, tn=128)
    out_bf = jax.block_until_ready(out_bf)
    assert out_bf.dtype == jnp.bfloat16 and out_bf.shape == (B, D)
    assert jnp.allclose(out_bf.astype(jnp.float32),
                        ref(batch_bf, 0).astype(jnp.float32),
                        atol=2e-2, rtol=2e-2), "bf16 scratch path mismatch"

    print("KERNEL_OK")
</pallas_src>

<mosaic_0001>
module attributes {stable_mosaic.version = 11 : i64} {
  func.func @kernel(%arg0: i32, %arg1: i32, %arg2: memref<1xi32, #tpu.memory_space<smem>>, %arg3: memref<8x256xbf16, #tpu.memory_space<vmem>>, %arg4: memref<1x256x256xbf16, #tpu.memory_space<vmem>>, %arg5: memref<1x1x256xbf16, #tpu.memory_space<vmem>>, %arg6: memref<8x256xf32, #tpu.memory_space<vmem>>) attributes {dimension_semantics = [#tpu.dimension_semantics<parallel>, #tpu.dimension_semantics<arbitrary>], iteration_bounds = array<i64: 1, 1>, scalar_prefetch = 1 : i64, scratch_operands = 0 : i64, tpu.core_type = #tpu.core_type<tc>, window_params = [{pipeline_mode = #tpu.pipeline_mode<synchronous>, transform_indices = @transform_0, window_bounds = array<i64: 8, 256>}, {transform_indices = @transform_1, window_bounds = array<i64: 1, 256, 256>}, {transform_indices = @transform_2, window_bounds = array<i64: 1, 1, 256>}, {transform_indices = @transform_3, window_bounds = array<i64: 8, 256>}]} {
    %c0_i32 = arith.constant 0 : i32
    %0 = arith.cmpi eq, %arg1, %c0_i32 : i32
    %1 = arith.extui %0 : i1 to i32
    %c0_i32_0 = arith.constant 0 : i32
    %2 = arith.cmpi ne, %1, %c0_i32_0 : i32
    scf.if %2 {
      %c0_8 = arith.constant 0 : index
      %c0_9 = arith.constant 0 : index
      %c0_10 = arith.constant 0 : index
      %13 = vector.load %arg5[%c0_8, %c0_9, %c0_10] : memref<1x1x256xbf16, #tpu.memory_space<vmem>>, vector<1x1x256xbf16>
      %14 = vector.shape_cast %13 : vector<1x1x256xbf16> to vector<1x256xbf16>
      %15 = arith.extf %14 : vector<1x256xbf16> to vector<1x256xf32>
      %16 = vector.shape_cast %15 : vector<1x256xf32> to vector<1x256xf32>
      %17 = vector.broadcast %16 : vector<1x256xf32> to vector<8x256xf32>
      %c0_11 = arith.constant 0 : index
      %c0_12 = arith.constant 0 : index
      %18 = vector.load %arg6[%c0_11, %c0_12] : memref<8x256xf32, #tpu.memory_space<vmem>>, vector<8x256xf32>
      tpu.vector_store %arg6[%c0_11, %c0_12], %17 {strides = array<i32>} : memref<8x256xf32, #tpu.memory_space<vmem>>, vector<8x256xf32>,
    } else {
    }
    %c256_i32 = arith.constant 256 : i32
    %3 = arith.muli %arg1, %c256_i32 : i32
    %4 = tpu.assume_multiple %3, 128 : i32
    %c0 = arith.constant 0 : index
    %5 = arith.index_cast %4 : i32 to index
    %6 = vector.load %arg3[%c0, %5] : memref<8x256xbf16, #tpu.memory_space<vmem>>, vector<8x256xbf16>
    %c0_1 = arith.constant 0 : index
    %c0_2 = arith.constant 0 : index
    %7 = vector.load %arg6[%c0_1, %c0_2] : memref<8x256xf32, #tpu.memory_space<vmem>>, vector<8x256xf32>
    %c0_3 = arith.constant 0 : index
    %c0_4 = arith.constant 0 : index
    %c0_5 = arith.constant 0 : index
    %8 = vector.load %arg4[%c0_3, %c0_4, %c0_5] : memref<1x256x256xbf16, #tpu.memory_space<vmem>>, vector<1x256x256xbf16>
    %9 = vector.shape_cast %8 : vector<1x256x256xbf16> to vector<256x256xbf16>
    %cst = arith.constant dense<0.000000e+00> : vector<8x256xf32>
    %10 = tpu.matmul %6, %9, %cst {dimension_numbers = #tpu.dot_dimension_numbers<[1], [0], [0], [1], [0, 0, 1, 1], [], []>} : vector<8x256xbf16>, vector<256x256xbf16>, vector<8x256xf32> -> vector<8x256xf32>
    %11 = arith.addf %7, %10 : vector<8x256xf32>
    %c0_6 = arith.constant 0 : index
    %c0_7 = arith.constant 0 : index
    %12 = vector.load %arg6[%c0_6, %c0_7] : memref<8x256xf32, #tpu.memory_space<vmem>>, vector<8x256xf32>
    tpu.vector_store %arg6[%c0_6, %c0_7], %11 {strides = array<i32>} : memref<8x256xf32, #tpu.memory_space<vmem>>, vector<8x256xf32>,
    return
  }
  func.func @transform_0(%arg0: i32, %arg1: i32, %arg2: memref<1xi32, #tpu.memory_space<smem>>) -> (i32, i32) {
    %c0_i32 = arith.constant 0 : i32
    %c0_i32_0 = arith.constant 0 : i32
    %c0_i32_1 = arith.constant 0 : i32
    return %c0_i32, %c0_i32_0 : i32, i32
  }
  func.func @transform_1(%arg0: i32, %arg1: i32, %arg2: memref<1xi32, #tpu.memory_space<smem>>) -> (i32, i32, i32) {
    %c0 = arith.constant 0 : index
    %0 = memref.load %arg2[%c0] : memref<1xi32, #tpu.memory_space<smem>>
    %c0_i32 = arith.constant 0 : i32
    return %0, %arg1, %arg0 : i32, i32, i32
  }
  func.func @transform_2(%arg0: i32, %arg1: i32, %arg2: memref<1xi32, #tpu.memory_space<smem>>) -> (i32, i32, i32) {
    %c0 = arith.constant 0 : index
    %0 = memref.load %arg2[%c0] : memref<1xi32, #tpu.memory_space<smem>>
    %c0_i32 = arith.constant 0 : i32
    %c0_i32_0 = arith.constant 0 : i32
    return %0, %c0_i32, %arg0 : i32, i32, i32
  }
  func.func @transform_3(%arg0: i32, %arg1: i32, %arg2: memref<1xi32, #tpu.memory_space<smem>>) -> (i32, i32) {
    %c0_i32 = arith.constant 0 : i32
    %c0_i32_0 = arith.constant 0 : i32
    return %c0_i32, %arg0 : i32, i32
  }
}

</mosaic_0001>

<bundles_post_ra>
// kernel: tpu_custom_call.1
= control target key start
LH: loop header
LB: loop body
LE: loop exit
PB: predicated region body
PF: predicated region fallthrough
CT: control target
= control target key end

     0   :  { %10 = vsyncpa [#allocation5], 0  ;;  %s564_s0 = inlined_call_operand.<no memory space> [shape: s32[1], index: 0, kind: input, shape index: {}]   ;;  %s565_s1 = inlined_call_operand.vmem [shape: bf16[8,256], index: 1, kind: input, shape index: {}]   ;;  %s566_s2 = inlined_call_operand.hbm [shape: bf16[3,256,256], index: 2, kind: input, shape index: {}]   ;;  %s567_s3 = inlined_call_operand.vmem [shape: bf16[3,1,256], index: 3, kind: input, shape index: {}]   ;;  %s568_s4 = inlined_call_operand.hbm [shape: f32[8,256], index: 4, kind: output, shape index: {}]  }
   0x1   :  { %11 = vsyncpa [#allocation6], 0  ;;  %s394_s17 = sshll.u32 %s564_s0, 12  ;;  %s499_s21 = smov [#allocation4]  }
   0x2   :  { %s22_s20 = scalar_lea.hbm %s566_s2, %s394_s17  ;;  %s23_s22 = sshll.u32 %s499_s21, 4  ;;  %s24_s22 = int_to_ptr.vmem [resolvable:$true] %s23_s22 }
   0x3   :  { %s449_s23 = scalar_lea.hbm %s22_s20, 4096  ;;  %s451_s26 = scalar_lea.hbm %s566_s2, 12288 }
   0x4   :  { %p450_p0 = scmp.ne.s32.totalorder %s22_s20, %s449_s23  ;;  %p452_p1 = scmp.lt.u32.totalorder %s22_s20, %s566_s2 }
   0x5   :  { %p453_p2 = scmp.lt.u32.totalorder %s451_s26, %s449_s23  ;;  %p455_p4 = scmp.lt.u32.totalorder %s449_s23, %s22_s20 }
   0x7   :  { %p454_p3 = por %p453_p2, %p452_p1 }
   0x9   :  { %p456_p5 = por %p455_p4, %p454_p3 }
   0xb   :  { %p457_p6 = pnand %p456_p5, %p450_p0 }
   0xd   :  { %460 = shalt.err (!%p457_p6)
}
   0xe   :  { %s461_s29 = scalar_lea.vmem %s24_s22, 4096  ;;  %p466_p8 = scmp.lt.s32.totalorder %s24_s22, %s24_s22 }
   0xf   :  { %p462_p7 = scmp.ne.s32.totalorder %s24_s22, %s461_s29  ;;  %p467_p9 = scmp.lt.s32.totalorder %s461_s29, %s461_s29 }
  0x11   :  { %p468_p10 = por %p467_p9, %p466_p8 }
  0x13   :  { %p469_p11 = pnand %p468_p10, %p462_p7 }
  0x15   :  { %472 = shalt.err (!%p469_p11)
}
  0x16   :  { %s500_s30 = smov 128   ;;  %s501_s5 = smov 8  }
  0x17   :  { %29 = dma.hbm_to_vmem [thread:$0]  %s22_s20, 4096, %s24_s22, [#allocation5], %s500_s30, %s500_s30, %s501_s5  }
  0x18   :  { %495 = dma.done.wait [#allocation5], 4096  }
  0x19   :  { %496 = vsyncadd [#allocation5], 4294963200  ;;  %v399_v0 = vld [vmem:[#allocation4 + $0x4] ss:$8 sps:$4 sm:$0xff]   ;;  %v401_v1 = vld [vmem:[#allocation4] ss:$8 sps:$4 sm:$0xff]   ;;  %v60_v35 = vlaneseq }
  0x1a   :  { %287 = vmatprep.subr.bf16.mxu0 %v399_v0  ;;  %v402_v2 = vld [vmem:[#allocation4 + $0x14] ss:$8 sps:$4 sm:$0xff]   ;;  %v404_v3 = vld [vmem:[#allocation4 + $0x10] ss:$8 sps:$4 sm:$0xff]   ;;  %v405_v4 = vld [vmem:[#allocation4 + $0x24] ss:$8 sps:$4 sm:$0xff]  }
  0x1b   :  { %288 = vmatpush1.bf16.msra.mxu0 %v401_v1  ;;  %v407_v5 = vld [vmem:[#allocation4 + $0x20] ss:$8 sps:$4 sm:$0xff]   ;;  %v408_v6 = vld [vmem:[#allocation4 + $0x34] ss:$8 sps:$4 sm:$0xff]   ;;  %v410_v7 = vld [vmem:[#allocation4 + $0x30] ss:$8 sps:$4 sm:$0xff]  }
  0x1c   :  { %289 = vmatprep.subr.bf16.mxu0 %v402_v2  ;;  %v411_v8 = vld [vmem:[#allocation4 + $0x44] ss:$8 sps:$4 sm:$0xff]   ;;  %v413_v9 = vld [vmem:[#allocation4 + $0x40] ss:$8 sps:$4 sm:$0xff]   ;;  %v414_v10 = vld [vmem:[#allocation4 + $0x54] ss:$8 sps:$4 sm:$0xff]  }
  0x1d   :  { %v416_v11 = vld [vmem:[#allocation4 + $0x50] ss:$8 sps:$4 sm:$0xff]   ;;  %v417_v12 = vld [vmem:[#allocation4 + $0x64] ss:$8 sps:$4 sm:$0xff]   ;;  %v419_v15 = vld [vmem:[#allocation4 + $0x60] ss:$8 sps:$4 sm:$0xff]  }
  0x1e   :  { %v85_v13 = vld [vmem:[%s565_s1] sm:$0xff]  ;;  %v420_v16 = vld [vmem:[#allocation4 + $0x74] ss:$8 sps:$4 sm:$0xff]   ;;  %v422_v17 = vld [vmem:[#allocation4 + $0x70] ss:$8 sps:$4 sm:$0xff]   ;;  %p48_p12 = scmp.lt.s32.totalorder %s564_s0, 2 }
  0x1f   :  { %290 = vmatpush1.bf16.msra.mxu0 %v404_v3  ;;  %v361_v14 = vcombine.high %v85_v13, %v85_v13  ;;  %v423_v18 = vld [vmem:[#allocation4 + $0x84] ss:$8 sps:$4 sm:$0xff]   ;;  %v425_v19 = vld [vmem:[#allocation4 + $0x80] ss:$8 sps:$4 sm:$0xff]   ;;  %v426_v20 = vld [vmem:[#allocation4 + $0x94] ss:$8 sps:$4 sm:$0xff]   ;;  %v360_v34 = vcombine.low %v85_v13, %v85_v13 }
  0x20   :  { %291 = vmatprep.subr.bf16.mxu0 %v405_v4  ;;  %v428_v21 = vld [vmem:[#allocation4 + $0x90] ss:$8 sps:$4 sm:$0xff]   ;;  %v429_v22 = vld [vmem:[#allocation4 + $0xa4] ss:$8 sps:$4 sm:$0xff]   ;;  %v431_v23 = vld [vmem:[#allocation4 + $0xa0] ss:$8 sps:$4 sm:$0xff]  }
  0x21   :  { %319 = vmatprep.mubr.bf16.mxu0 %v361_v14  ;;  %v432_v24 = vld [vmem:[#allocation4 + $0xb4] ss:$8 sps:$4 sm:$0xff]   ;;  %v434_v25 = vld [vmem:[#allocation4 + $0xb0] ss:$8 sps:$4 sm:$0xff]   ;;  %v435_v26 = vld [vmem:[#allocation4 + $0xc4] ss:$8 sps:$4 sm:$0xff]  }
  0x22   :  { %v437_v27 = vld [vmem:[#allocation4 + $0xc0] ss:$8 sps:$4 sm:$0xff]   ;;  %v438_v28 = vld [vmem:[#allocation4 + $0xd4] ss:$8 sps:$4 sm:$0xff]   ;;  %v440_v29 = vld [vmem:[#allocation4 + $0xd0] ss:$8 sps:$4 sm:$0xff]  }
  0x23   :  { %292 = vmatpush1.bf16.msra.mxu0 %v407_v5  ;;  %v441_v30 = vld [vmem:[#allocation4 + $0xe4] ss:$8 sps:$4 sm:$0xff]   ;;  %v443_v31 = vld [vmem:[#allocation4 + $0xe0] ss:$8 sps:$4 sm:$0xff]   ;;  %v444_v32 = vld [vmem:[#allocation4 + $0xf4] ss:$8 sps:$4 sm:$0xff]  }
  0x24   :  { %293 = vmatprep.subr.bf16.mxu0 %v408_v6  ;;  %v446_v33 = vld [vmem:[#allocation4 + $0xf0] ss:$8 sps:$4 sm:$0xff]   ;;  %s570_s0 = smov (!%p48_p12, %s564_s0), 2  ;;  %v61_v36 = vshrl.u32 %v60_v35, 7  ;;  %s502_s14 = smov [#allocation7]  }
  0x25   :  { %s359_s10 = sshll.u32 %s570_s0, 1  ;;  %s338_s15 = sshll.u32 %s502_s14, 4  ;;  %s339_s15 = int_to_ptr.vmem [resolvable:$true] %s338_s15 }
  0x26   :  { %s51_s13 = scalar_lea.vmem %s567_s3, %s359_s10  ;;  %v62_v39 = vsub.s32 0, %v61_v36  ;;  %v66_v40 = vsub.s32 2, %v61_v36  ;;  %s473_s0 = scalar_lea.vmem %s339_s15, 256 }
  0x27   :  { %294 = vmatpush1.bf16.msra.mxu0 %v410_v7  ;;  %v57_v37 = vld [vmem:[%s51_s13] sm:$0x3]  ;;  %p474_p13 = scmp.ne.s32.totalorder %s339_s15, %s473_s0  ;;  %p478_p0 = scmp.lt.s32.totalorder %s339_s15, %s339_s15 }
  0x28   :  { %295 = vmatprep.subr.bf16.mxu0 %v411_v8  ;;  %v58_v38 = vunpack.c.l.bf16 %v57_v37  ;;  %p479_p1 = scmp.lt.s32.totalorder %s473_s0, %s473_s0 }
  0x2a   :  { %v63_v41 = vrot.slane %v58_v38, %v62_v39  ;;  %v67_v42 = vrot.slane %v58_v38, %v66_v40  ;;  %p480_p2 = por %p479_p1, %p478_p0 }
  0x2b   :  { %296 = vmatpush1.bf16.msra.mxu0 %v413_v9 }
  0x2c   :  { %297 = vmatprep.subr.bf16.mxu0 %v414_v10  ;;  %v73_v43 = vrot.slane %v63_v41, %v62_v39  ;;  %v77_v44 = vrot.slane %v67_v42, %v62_v39  ;;  %p481_p3 = pnand %p480_p2, %p474_p13 }
  0x2f   :  { %298 = vmatpush1.bf16.msra.mxu0 %v416_v11 }
  0x30   :  { %299 = vmatprep.subr.bf16.mxu0 %v417_v12 }
  0x33   :  { %300 = vmatpush1.bf16.msra.mxu0 %v419_v15 }
  0x34   :  { %301 = vmatprep.subr.bf16.mxu0 %v420_v16 }
  0x37   :  { %302 = vmatpush1.bf16.msra.mxu0 %v422_v17 }
  0x38   :  { %303 = vmatprep.subr.bf16.mxu0 %v423_v18 }
  0x3b   :  { %304 = vmatpush1.bf16.msra.mxu0 %v425_v19 }
  0x3c   :  { %305 = vmatprep.subr.bf16.mxu0 %v426_v20 }
  0x3f   :  { %306 = vmatpush1.bf16.msra.mxu0 %v428_v21 }
  0x40   :  { %307 = vmatprep.subr.bf16.mxu0 %v429_v22 }
  0x43   :  { %308 = vmatpush1.bf16.msra.mxu0 %v431_v23 }
  0x44   :  { %309 = vmatprep.subr.bf16.mxu0 %v432_v24 }
  0x47   :  { %310 = vmatpush1.bf16.msra.mxu0 %v434_v25 }
  0x48   :  { %311 = vmatprep.subr.bf16.mxu0 %v435_v26 }
  0x4b   :  { %312 = vmatpush1.bf16.msra.mxu0 %v437_v27 }
  0x4c   :  { %313 = vmatprep.subr.bf16.mxu0 %v438_v28 }
  0x4f   :  { %314 = vmatpush1.bf16.msra.mxu0 %v440_v29 }
  0x50   :  { %315 = vmatprep.subr.bf16.mxu0 %v441_v30 }
  0x53   :  { %316 = vmatpush1.bf16.msra.mxu0 %v443_v31 }
  0x54   :  { %317 = vmatprep.subr.bf16.mxu0 %v444_v32 }
  0x57   :  { %318 = vmatpush1.bf16.msra.mxu0 %v446_v33 }
  0x5a   :  { %320 = vmatmul.mubr.bf16.vlgmr.msra.gmra.mrb[0].mxu0 %v360_v34 }
 0x12d   :  { %v321_v45 = vpop.f32.mrb[0].mxu0 }
 0x12e   :  { %v328_v46 = vadd.f32 %v321_v45, %v73_v43  ;;  %v323_v47 = vpop.f32.mrb[1].mxu0 }
 0x12f   :  { %v329_v48 = vadd.f32 %v323_v47, %v77_v44  ;;  %v325_v49 = vpop.f32.mrb[2].mxu0 }
 0x130   :  { %330 = vst [vmem:[#allocation7] sm:$0xff] %v328_v46  ;;  %v326_v50 = vpop.f32.mrb[3].mxu0 }
 0x131   :  { %331 = vst [vmem:[#allocation7 + $0x8] sm:$0xff] %v329_v48 }
 0x132   :  { %484 = shalt.err (!%p481_p3)
}
 0x133   :  { %s485_s17 = scalar_lea.hbm %s568_s4, 256 }
 0x134   :  { %p486_p4 = scmp.ne.s32.totalorder %s568_s4, %s485_s17  ;;  %p489_p5 = scmp.lt.u32.totalorder %s485_s17, %s568_s4 }
 0x136   :  { %p491_p6 = pnand %p489_p5, %p486_p4 }
 0x138   :  { %494 = shalt.err (!%p491_p6)
}
 0x139   :  { %341 = dma.vmem_to_hbm [thread:$0]  %s339_s15, 256, %s568_s4, [#allocation6]  }
 0x13a   :  { %497 = dma.done.wait [#allocation6], 256  }
 0x13b   :  { %498 = vsyncadd [#allocation6], 4294967040 }
 0x13c   :  { %345 = vsyncpa [#allocation5], 1 }
 0x13d   :  { %346 = vsyncpa [#allocation6], 1 }

</bundles_post_ra>
